<compile_context>
chip_gen: v5e
topology: v5e:2x2
jax: 0.10.0
libtpu: 0.0.40
codegen_flags: <defaults>
</compile_context>

<pallas_src>
import functools
import math

import jax
import jax.numpy as jnp
from jax.experimental import pallas as pl
from jax.experimental.pallas import tpu as pltpu


# ---------------------------------------------------------------------------
# Fused ELBO kernel
# ---------------------------------------------------------------------------
def _elbo_kernel(x_ref, y_ref, mq_ref, lq_ref, mp_ref, lp_ref,
                 out_ref, acc_ref, *, hw, nt, nt_half, off, overlap, mask_tail):
    p = pl.program_id(0)          # core split (size 1 on v5e/v6e)
    b = pl.program_id(1)          # image batch (arbitrary / reduction)
    j = pl.program_id(2)          # HW-row tile within this core's range

    @pl.when(jnp.logical_and(b == 0, j == 0))
    def _init():
        acc_ref[...] = jnp.zeros_like(acc_ref)

    t = p * off + j               # global HW-row-tile index (always in-bounds)
    c, rows, _ = x_ref.shape      # (C, rows, 128) dense block

    def _ce_accumulate():
        # Cast only — no whole-slab sanitize. Garbage in padded rows/lanes stays
        # column-local through max/exp/log and is masked out right before accumulation.
        x = x_ref[...].astype(jnp.float32)            # (C, rows, 128)
        y = y_ref[...].astype(jnp.int32)              # (rows, 128), native dtype streamed

        # Class reduction over the leading (non-minor) axis: plain VPU ops, dense EUP.
        m = jnp.max(x, axis=0)                        # (rows, 128)
        e = jnp.exp(x - m)                            # (C, rows, 128), 8/8 sublanes
        lse = m + jnp.log(jnp.sum(e, axis=0))         # (rows, 128)

        # Gather-free true-class logit (C is small, unrolled selects).
        true_logit = jnp.zeros_like(m)
        for ci in range(c):
            true_logit = true_logit + jnp.where(y == ci, x[ci], 0.0)

        ce = lse - true_logit                         # (rows, 128) per-pixel CE

        if mask_tail:
            # Only the tail tile pays for masking; interior tiles are mask-free.
            @pl.when(t == nt - 1)
            def _tail():
                row = jax.lax.broadcasted_iota(jnp.int32, ce.shape, 0)
                lane = jax.lax.broadcasted_iota(jnp.int32, ce.shape, 1)
                flat = (t * rows + row) * 128 + lane
                acc_ref[...] += jnp.where(flat < hw, ce, 0.0)

            @pl.when(t != nt - 1)
            def _interior():
                acc_ref[...] += ce
        else:
            acc_ref[...] += ce

    if overlap:
        # Odd tile count under the 2-way split: core 1 skips the duplicated overlap
        # tile entirely (its DMA still lands, compute is zero).
        @pl.when(t >= p * nt_half)
        def _owned():
            _ce_accumulate()
    else:
        _ce_accumulate()

    last = jnp.logical_and(b == pl.num_programs(1) - 1,
                           j == pl.num_programs(2) - 1)

    @pl.when(last)
    def _finalize():
        ce_part = jnp.sum(acc_ref[...])               # single cross-lane/sublane reduce

        # KL integrand over the tiny, VMEM-resident latent tensors.
        # Reworked as exp(lv_q - lv_p) + (dmu)^2 * exp(-lv_p): avoids the fragile
        # exp(lv_q)/exp(lv_p) overflow/underflow of the literal formula.
        mu_q = mq_ref[...].astype(jnp.float32)
        lv_q = lq_ref[...].astype(jnp.float32)
        mu_p = mp_ref[...].astype(jnp.float32)
        lv_p = lp_ref[...].astype(jnp.float32)
        d = lv_p - lv_q
        kl_sum = jnp.sum(d + jnp.exp(-d) + (mu_q - mu_p) ** 2 * jnp.exp(-lv_p) - 1.0)

        lane_o = jax.lax.broadcasted_iota(jnp.int32, out_ref.shape, 1)
        out_ref[...] = jnp.where(lane_o == 0, ce_part,
                                 jnp.where(lane_o == 1, kl_sum, 0.0))


def _choose_block_rows(hw128: int, c: int, itemsize: int,
                       budget_bytes: int = 4 << 20) -> int:
    """Rows (sublane extent) giving ~4 MiB of logits per step; multiple of 32 so the
    same block size is legal for f32/bf16 logits and int32/int8 labels."""
    rows = budget_bytes // max(1, c * 128 * itemsize)
    rows = max(32, (rows // 32) * 32)
    return hw128 if rows >= hw128 else int(rows)


def _num_split_cores() -> int:
    # TODO(synk): on v7x verify the leading "parallel" axis really shards across the two
    # TensorCores (else switch to pltpu.CORE_PARALLEL / pl.core_map). v5e/v6e have a single
    # TC, so splitting there only adds overhead.
    try:
        kind = jax.devices()[0].device_kind.lower()
    except Exception:
        return 1
    return 2 if ("v7" in kind or "7x" in kind) else 1


# ---------------------------------------------------------------------------
# ELBOLoss forward
# ---------------------------------------------------------------------------
@functools.partial(jax.jit, static_argnames=("beta", "block_rows"))
def elbo_loss(logits, y_true, prior_mu, prior_logvar, post_mu, post_logvar,
              beta=1.0, block_rows=None):
    # logits: (B, C, H, W);  y_true: (B, 1, H, W) or (B, H, W), any integer dtype
    if y_true.ndim == logits.ndim and y_true.shape[1] == 1:
        y_true = jnp.squeeze(y_true, axis=1)

    b, c = logits.shape[0], logits.shape[1]
    hw = math.prod(logits.shape[2:])
    hw128 = -(-hw // 128)
    hw_pad = hw128 * 128

    # Dense layout: HW over sublanes AND lanes. No dtype widening in the wrapper.
    x = logits.reshape(b, c, hw)
    y = y_true.reshape(b, hw)                     # native dtype; cast happens in-kernel
    if hw_pad != hw:                              # pad once so HW is a multiple of 128
        x = jnp.pad(x, ((0, 0), (0, 0), (0, hw_pad - hw)))
        y = jnp.pad(y, ((0, 0), (0, hw_pad - hw)))
    x = x.reshape(b, c, hw128, 128)
    y = y.reshape(b, hw128, 128)

    # Latent Gaussians flattened to (B_lat, D_lat); resident in VMEM for the whole grid.
    bl = post_mu.shape[0]
    dl = int(post_mu.size // bl)
    mq = post_mu.reshape(bl, dl)
    lq = post_logvar.reshape(bl, dl)
    mp = prior_mu.reshape(bl, dl)
    lp = prior_logvar.reshape(bl, dl)

    if block_rows is None:
        rows = _choose_block_rows(hw128, c, x.dtype.itemsize)
    else:
        rows = int(block_rows)
        if rows < hw128:
            assert rows % 8 == 0, "block_rows must be a multiple of 8 (or >= HW/128)"
    rows = min(rows, hw128)

    nt = -(-hw128 // rows)                        # total HW-row tiles
    ncores = _num_split_cores() if nt >= 2 else 1
    nt_half = -(-nt // ncores)                    # tiles per core
    off = (nt - nt_half) if ncores == 2 else 0    # core-1 start (keeps indices in-bounds)
    overlap = (ncores == 2) and (nt % 2 == 1)
    mask_tail = (nt * rows * 128) != hw           # any lane/row padding at all?

    kernel = functools.partial(_elbo_kernel, hw=hw, nt=nt, nt_half=nt_half,
                               off=off, overlap=overlap, mask_tail=mask_tail)

    x_spec = pl.BlockSpec((None, c, rows, 128), lambda p, bb, j: (bb, 0, p * off + j, 0))
    y_spec = pl.BlockSpec((None, rows, 128), lambda p, bb, j: (bb, p * off + j, 0))
    lat_spec = pl.BlockSpec((bl, dl), lambda p, bb, j: (0, 0))
    out_spec = pl.BlockSpec((None, 1, 128), lambda p, bb, j: (p, 0, 0))

    # Explicit VMEM limit sized from the real footprint (2x double-buffered inputs +
    # accumulator + latents), clamped to stay friendly to v5e defaults and v7x's 64 MiB/TC.
    blk_bytes = c * rows * 128 * x.dtype.itemsize + rows * 128 * y.dtype.itemsize
    lat_bytes = 4 * bl * dl * post_mu.dtype.itemsize
    vmem_limit = int(min(max(2 * blk_bytes + rows * 128 * 4 + 2 * lat_bytes + (2 << 20),
                             32 << 20), 48 << 20))

    cost = pl.CostEstimate(
        flops=int(8 * b * c * hw_pad + 8 * 4 * bl * dl),
        transcendentals=int(b * hw_pad * (c + 1) + 2 * bl * dl),
        bytes_accessed=int(x.size * x.dtype.itemsize + y.size * y.dtype.itemsize
                           + 4 * bl * dl * post_mu.dtype.itemsize),
    )

    out = pl.pallas_call(
        kernel,
        out_shape=jax.ShapeDtypeStruct((ncores, 1, 128), jnp.float32),
        grid=(ncores, b, nt_half),
        in_specs=[x_spec, y_spec, lat_spec, lat_spec, lat_spec, lat_spec],
        out_specs=out_spec,
        scratch_shapes=[pltpu.VMEM((rows, 128), jnp.float32)],
        compiler_params=pltpu.CompilerParams(
            dimension_semantics=(("parallel" if ncores == 2 else "arbitrary"),
                                 "arbitrary", "arbitrary"),
            vmem_limit_bytes=vmem_limit),
        cost_estimate=cost,
    )(x, y, mq, lq, mp, lp)

    ce_mean = jnp.sum(out[:, 0, 0]) / jnp.float32(b * hw)   # mean CE over all pixels
    kl_mean = 0.5 * out[0, 0, 1] / jnp.float32(bl)          # mean over latent batch
    # elbo_loss = -(log_likelihood - beta * kl) = CE + beta * KL
    return ce_mean + jnp.float32(beta) * kl_mean


# ---------------------------------------------------------------------------
# pure-JAX reference for sanity checking
# ---------------------------------------------------------------------------
def _ref_elbo(logits, y_true, prior_mu, prior_logvar, post_mu, post_logvar, beta=1.0):
    if y_true.ndim == logits.ndim and y_true.shape[1] == 1:
        y_true = jnp.squeeze(y_true, axis=1)
    logits = logits.astype(jnp.float32)
    logp = jax.nn.log_softmax(logits, axis=1)
    c = logits.shape[1]
    onehot = jax.nn.one_hot(y_true, c, axis=1, dtype=jnp.float32)
    ce = -jnp.mean(jnp.sum(onehot * logp, axis=1))
    kl_b = 0.5 * jnp.sum(
        prior_logvar - post_logvar
        + (jnp.exp(post_logvar) + (post_mu - prior_mu) ** 2) / jnp.exp(prior_logvar)
        - 1.0,
        axis=tuple(range(1, prior_mu.ndim)),
    )
    kl = jnp.mean(kl_b)
    return ce + beta * kl


if __name__ == "__main__":
    keys = jax.random.split(jax.random.PRNGKey(0), 18)

    # --- test 1: module-default shapes (n_classes=2), single full-extent block ----------
    B, C, H, W = 2, 2, 16, 16
    LB, LC, LH, LW = 2, 4, 8, 8
    logits = jax.random.normal(keys[0], (B, C, H, W), dtype=jnp.float32)
    y_true = jax.random.randint(keys[1], (B, 1, H, W), 0, C, dtype=jnp.int32)
    prior_mu = jax.random.normal(keys[2], (LB, LC, LH, LW), dtype=jnp.float32)
    prior_logvar = 0.1 * jax.random.normal(keys[3], (LB, LC, LH, LW), dtype=jnp.float32)
    post_mu = jax.random.normal(keys[4], (LB, LC, LH, LW), dtype=jnp.float32)
    post_logvar = 0.1 * jax.random.normal(keys[5], (LB, LC, LH, LW), dtype=jnp.float32)

    loss = elbo_loss(logits, y_true, prior_mu, prior_logvar, post_mu, post_logvar, beta=1.0)
    loss = jax.block_until_ready(loss)
    ref = _ref_elbo(logits, y_true, prior_mu, prior_logvar, post_mu, post_logvar, beta=1.0)
    assert jnp.allclose(loss, ref, rtol=1e-5, atol=1e-5), (loss, ref)

    # --- test 2: multi-tile grid (odd tile count) + lane/row padding + masked tail ------
    B2, C2, H2, W2 = 2, 3, 48, 50        # HW=2400 -> 19 rows of 128 (32 padded lanes)
    LB2, LC2, LH2, LW2 = 2, 3, 4, 4
    logits2 = jax.random.normal(keys[6], (B2, C2, H2, W2), dtype=jnp.float32)
    y_true2 = jax.random.randint(keys[7], (B2, H2, W2), 0, C2, dtype=jnp.int32)
    prior_mu2 = jax.random.normal(keys[8], (LB2, LC2, LH2, LW2), dtype=jnp.float32)
    prior_logvar2 = 0.1 * jax.random.normal(keys[9], (LB2, LC2, LH2, LW2), dtype=jnp.float32)
    post_mu2 = jax.random.normal(keys[10], (LB2, LC2, LH2, LW2), dtype=jnp.float32)
    post_logvar2 = 0.1 * jax.random.normal(keys[11], (LB2, LC2, LH2, LW2), dtype=jnp.float32)

    loss2 = elbo_loss(logits2, y_true2, prior_mu2, prior_logvar2, post_mu2, post_logvar2,
                      beta=0.5, block_rows=8)   # forces 3 row-tiles, masked tail tile
    loss2 = jax.block_until_ready(loss2)
    ref2 = _ref_elbo(logits2, y_true2, prior_mu2, prior_logvar2, post_mu2, post_logvar2,
                     beta=0.5)
    assert jnp.allclose(loss2, ref2, rtol=1e-5, atol=1e-5), (loss2, ref2)

    # --- test 3: narrow (int8) labels streamed without wrapper widening ------------------
    B3, C3, H3, W3 = 1, 4, 16, 16
    LB3, LC3, LH3, LW3 = 1, 2, 4, 4
    logits3 = jax.random.normal(keys[12], (B3, C3, H3, W3), dtype=jnp.float32)
    y_true3 = jax.random.randint(keys[13], (B3, H3, W3), 0, C3, dtype=jnp.int8)
    prior_mu3 = jax.random.normal(keys[14], (LB3, LC3, LH3, LW3), dtype=jnp.float32)
    prior_logvar3 = 0.1 * jax.random.normal(keys[15], (LB3, LC3, LH3, LW3), dtype=jnp.float32)
    post_mu3 = jax.random.normal(keys[16], (LB3, LC3, LH3, LW3), dtype=jnp.float32)
    post_logvar3 = 0.1 * jax.random.normal(keys[17], (LB3, LC3, LH3, LW3), dtype=jnp.float32)

    loss3 = elbo_loss(logits3, y_true3, prior_mu3, prior_logvar3, post_mu3, post_logvar3,
                      beta=2.0)
    loss3 = jax.block_until_ready(loss3)
    ref3 = _ref_elbo(logits3, y_true3, prior_mu3, prior_logvar3, post_mu3, post_logvar3,
                     beta=2.0)
    assert jnp.allclose(loss3, ref3, rtol=1e-5, atol=1e-5), (loss3, ref3)

    print("KERNEL_OK")
</pallas_src>

<mosaic_0001>
module attributes {stable_mosaic.version = 11 : i64} {
  func.func @_elbo_kernel(%arg0: i32, %arg1: i32, %arg2: i32, %arg3: memref<1x2x2x128xf32, #tpu.memory_space<vmem>>, %arg4: memref<1x2x128xi32, #tpu.memory_space<vmem>>, %arg5: memref<2x256xf32, #tpu.memory_space<vmem>>, %arg6: memref<2x256xf32, #tpu.memory_space<vmem>>, %arg7: memref<2x256xf32, #tpu.memory_space<vmem>>, %arg8: memref<2x256xf32, #tpu.memory_space<vmem>>, %arg9: memref<1x1x128xf32, #tpu.memory_space<vmem>>, %arg10: memref<2x128xf32, #tpu.memory_space<vmem>>) attributes {dimension_semantics = [#tpu.dimension_semantics<arbitrary>, #tpu.dimension_semantics<arbitrary>, #tpu.dimension_semantics<arbitrary>], iteration_bounds = array<i64: 1, 2, 1>, scalar_prefetch = 0 : i64, scratch_operands = 1 : i64, tpu.core_type = #tpu.core_type<tc>, window_params = [{transform_indices = @transform_0, window_bounds = array<i64: 1, 2, 2, 128>}, {transform_indices = @transform_1, window_bounds = array<i64: 1, 2, 128>}, {pipeline_mode = #tpu.pipeline_mode<synchronous>, transform_indices = @transform_2, window_bounds = array<i64: 2, 256>}, {pipeline_mode = #tpu.pipeline_mode<synchronous>, transform_indices = @transform_3, window_bounds = array<i64: 2, 256>}, {pipeline_mode = #tpu.pipeline_mode<synchronous>, transform_indices = @transform_4, window_bounds = array<i64: 2, 256>}, {pipeline_mode = #tpu.pipeline_mode<synchronous>, transform_indices = @transform_5, window_bounds = array<i64: 2, 256>}, {transform_indices = @transform_6, window_bounds = array<i64: 1, 1, 128>}]} {
    %c0_i32 = arith.constant 0 : i32
    %0 = arith.cmpi eq, %arg1, %c0_i32 : i32
    %c0_i32_0 = arith.constant 0 : i32
    %1 = arith.cmpi eq, %arg2, %c0_i32_0 : i32
    %2 = arith.andi %0, %1 : i1
    %3 = arith.extui %2 : i1 to i32
    %c0_i32_1 = arith.constant 0 : i32
    %4 = arith.cmpi ne, %3, %c0_i32_1 : i32
    scf.if %4 {
      %cst_20 = arith.constant 0.000000e+00 : f32
      %41 = vector.broadcast %cst_20 : f32 to vector<2x128xf32>
      %c0_21 = arith.constant 0 : index
      %c0_22 = arith.constant 0 : index
      %42 = vector.load %arg10[%c0_21, %c0_22] : memref<2x128xf32, #tpu.memory_space<vmem>>, vector<2x128xf32>
      tpu.vector_store %arg10[%c0_21, %c0_22], %41 {strides = array<i32>} : memref<2x128xf32, #tpu.memory_space<vmem>>, vector<2x128xf32>,
    } else {
    }
    %c0 = arith.constant 0 : index
    %c0_2 = arith.constant 0 : index
    %c0_3 = arith.constant 0 : index
    %c0_4 = arith.constant 0 : index
    %5 = vector.load %arg3[%c0, %c0_2, %c0_3, %c0_4] : memref<1x2x2x128xf32, #tpu.memory_space<vmem>>, vector<1x2x2x128xf32>
    %6 = vector.shape_cast %5 : vector<1x2x2x128xf32> to vector<2x2x128xf32>
    %c0_5 = arith.constant 0 : index
    %c0_6 = arith.constant 0 : index
    %c0_7 = arith.constant 0 : index
    %7 = vector.load %arg4[%c0_5, %c0_6, %c0_7] : memref<1x2x128xi32, #tpu.memory_space<vmem>>, vector<1x2x128xi32>
    %8 = vector.shape_cast %7 : vector<1x2x128xi32> to vector<2x128xi32>
    %cst = arith.constant dense<0xFF800000> : vector<2x128xf32>
    %9 = vector.multi_reduction <maximumf>, %6, %cst [0] : vector<2x2x128xf32> to vector<2x128xf32>
    %10 = vector.shape_cast %9 : vector<2x128xf32> to vector<1x2x128xf32>
    %11 = vector.broadcast %10 : vector<1x2x128xf32> to vector<2x2x128xf32>
    %12 = arith.subf %6, %11 : vector<2x2x128xf32>
    %13 = math.exp %12 : vector<2x2x128xf32>
    %cst_8 = arith.constant dense<0.000000e+00> : vector<2x128xf32>
    %14 = vector.multi_reduction <add>, %13, %cst_8 [0] : vector<2x2x128xf32> to vector<2x128xf32>
    %15 = math.log %14 : vector<2x128xf32>
    %16 = arith.addf %9, %15 : vector<2x128xf32>
    %cst_9 = arith.constant 0.000000e+00 : f32
    %17 = vector.broadcast %cst_9 : f32 to vector<2x128xf32>
    %c0_i32_10 = arith.constant 0 : i32
    %18 = vector.broadcast %c0_i32_10 : i32 to vector<2x128xi32>
    %19 = arith.cmpi eq, %8, %18 : vector<2x128xi32>
    %20 = vector.extract_strided_slice %6 {offsets = [0, 0, 0], sizes = [1, 2, 128], strides = [1, 1, 1]} : vector<2x2x128xf32> to vector<1x2x128xf32>
    %21 = vector.shape_cast %20 : vector<1x2x128xf32> to vector<2x128xf32>
    %cst_11 = arith.constant 0.000000e+00 : f32
    %22 = vector.broadcast %cst_11 : f32 to vector<2x128xf32>
    %23 = arith.select %19, %21, %22 : vector<2x128xi1>, vector<2x128xf32>
    %24 = arith.addf %17, %23 : vector<2x128xf32>
    %c1_i32 = arith.constant 1 : i32
    %25 = vector.broadcast %c1_i32 : i32 to vector<2x128xi32>
    %26 = arith.cmpi eq, %8, %25 : vector<2x128xi32>
    %27 = vector.extract_strided_slice %6 {offsets = [1, 0, 0], sizes = [1, 2, 128], strides = [1, 1, 1]} : vector<2x2x128xf32> to vector<1x2x128xf32>
    %28 = vector.shape_cast %27 : vector<1x2x128xf32> to vector<2x128xf32>
    %cst_12 = arith.constant 0.000000e+00 : f32
    %29 = vector.broadcast %cst_12 : f32 to vector<2x128xf32>
    %30 = arith.select %26, %28, %29 : vector<2x128xi1>, vector<2x128xf32>
    %31 = arith.addf %24, %30 : vector<2x128xf32>
    %32 = arith.subf %16, %31 : vector<2x128xf32>
    %c0_13 = arith.constant 0 : index
    %c0_14 = arith.constant 0 : index
    %33 = vector.load %arg10[%c0_13, %c0_14] : memref<2x128xf32, #tpu.memory_space<vmem>>, vector<2x128xf32>
    %34 = arith.addf %33, %32 : vector<2x128xf32>
    %c0_15 = arith.constant 0 : index
    %c0_16 = arith.constant 0 : index
    %35 = vector.load %arg10[%c0_15, %c0_16] : memref<2x128xf32, #tpu.memory_space<vmem>>, vector<2x128xf32>
    tpu.vector_store %arg10[%c0_15, %c0_16], %34 {strides = array<i32>} : memref<2x128xf32, #tpu.memory_space<vmem>>, vector<2x128xf32>,
    %c1_i32_17 = arith.constant 1 : i32
    %36 = arith.cmpi eq, %arg1, %c1_i32_17 : i32
    %c0_i32_18 = arith.constant 0 : i32
    %37 = arith.cmpi eq, %arg2, %c0_i32_18 : i32
    %38 = arith.andi %36, %37 : i1
    %39 = arith.extui %38 : i1 to i32
    %c0_i32_19 = arith.constant 0 : i32
    %40 = arith.cmpi ne, %39, %c0_i32_19 : i32
    scf.if %40 {
      %c0_20 = arith.constant 0 : index
      %c0_21 = arith.constant 0 : index
      %41 = vector.load %arg10[%c0_20, %c0_21] : memref<2x128xf32, #tpu.memory_space<vmem>>, vector<2x128xf32>
      %42 = vector.shape_cast %41 : vector<2x128xf32> to vector<1x2x128xf32>
      %cst_22 = arith.constant dense<0.000000e+00> : vector<1xf32>
      %43 = vector.multi_reduction <add>, %42, %cst_22 [1, 2] : vector<1x2x128xf32> to vector<1xf32>
      %44 = vector.shape_cast %43 : vector<1xf32> to vector<1x1x1xf32>
      %45 = vector.extract %44[0, 0, 0] : f32 from vector<1x1x1xf32>
      %c0_23 = arith.constant 0 : index
      %c0_24 = arith.constant 0 : index
      %46 = vector.load %arg5[%c0_23, %c0_24] : memref<2x256xf32, #tpu.memory_space<vmem>>, vector<2x256xf32>
      %c0_25 = arith.constant 0 : index
      %c0_26 = arith.constant 0 : index
      %47 = vector.load %arg6[%c0_25, %c0_26] : memref<2x256xf32, #tpu.memory_space<vmem>>, vector<2x256xf32>
      %c0_27 = arith.constant 0 : index
      %c0_28 = arith.constant 0 : index
      %48 = vector.load %arg7[%c0_27, %c0_28] : memref<2x256xf32, #tpu.memory_space<vmem>>, vector<2x256xf32>
      %c0_29 = arith.constant 0 : index
      %c0_30 = arith.constant 0 : index
      %49 = vector.load %arg8[%c0_29, %c0_30] : memref<2x256xf32, #tpu.memory_space<vmem>>, vector<2x256xf32>
      %50 = arith.subf %49, %47 : vector<2x256xf32>
      %cst_31 = arith.constant 0.000000e+00 : f32
      %51 = vector.broadcast %cst_31 : f32 to vector<2x256xf32>
      %52 = arith.subf %51, %50 : vector<2x256xf32>
      %53 = math.exp %52 : vector<2x256xf32>
      %54 = arith.addf %50, %53 : vector<2x256xf32>
      %55 = arith.subf %46, %48 : vector<2x256xf32>
      %56 = arith.mulf %55, %55 : vector<2x256xf32>
      %cst_32 = arith.constant 0.000000e+00 : f32
      %57 = vector.broadcast %cst_32 : f32 to vector<2x256xf32>
      %58 = arith.subf %57, %49 : vector<2x256xf32>
      %59 = math.exp %58 : vector<2x256xf32>
      %60 = arith.mulf %56, %59 : vector<2x256xf32>
      %61 = arith.addf %54, %60 : vector<2x256xf32>
      %cst_33 = arith.constant 1.000000e+00 : f32
      %62 = vector.broadcast %cst_33 : f32 to vector<2x256xf32>
      %63 = arith.subf %61, %62 : vector<2x256xf32>
      %64 = vector.shape_cast %63 : vector<2x256xf32> to vector<1x2x256xf32>
      %cst_34 = arith.constant dense<0.000000e+00> : vector<1xf32>
      %65 = vector.multi_reduction <add>, %64, %cst_34 [1, 2] : vector<1x2x256xf32> to vector<1xf32>
      %66 = vector.shape_cast %65 : vector<1xf32> to vector<1x1x1xf32>
      %67 = vector.extract %66[0, 0, 0] : f32 from vector<1x1x1xf32>
      %68 = tpu.iota {dimensions = array<i32: 1>} : vector<1x128xi32>
      %c0_i32_35 = arith.constant 0 : i32
      %69 = vector.broadcast %c0_i32_35 : i32 to vector<1x128xi32>
      %70 = arith.cmpi eq, %68, %69 : vector<1x128xi32>
      %c1_i32_36 = arith.constant 1 : i32
      %71 = vector.broadcast %c1_i32_36 : i32 to vector<1x128xi32>
      %72 = arith.cmpi eq, %68, %71 : vector<1x128xi32>
      %cst_37 = arith.constant 0.000000e+00 : f32
      %73 = vector.broadcast %67 : f32 to vector<1x128xf32>
      %74 = vector.broadcast %cst_37 : f32 to vector<1x128xf32>
      %75 = arith.select %72, %73, %74 : vector<1x128xi1>, vector<1x128xf32>
      %76 = vector.broadcast %45 : f32 to vector<1x128xf32>
      %77 = arith.select %70, %76, %75 : vector<1x128xi1>, vector<1x128xf32>
      %c0_38 = arith.constant 0 : index
      %c0_39 = arith.constant 0 : index
      %c0_40 = arith.constant 0 : index
      %78 = vector.load %arg9[%c0_38, %c0_39, %c0_40] : memref<1x1x128xf32, #tpu.memory_space<vmem>>, vector<1x1x128xf32>
      %79 = vector.shape_cast %78 : vector<1x1x128xf32> to vector<1x128xf32>
      %80 = vector.shape_cast %77 : vector<1x128xf32> to vector<1x1x128xf32>
      tpu.vector_store %arg9[%c0_38, %c0_39, %c0_40], %80 {strides = array<i32>} : memref<1x1x128xf32, #tpu.memory_space<vmem>>, vector<1x1x128xf32>,
    } else {
    }
    return
  }
  func.func @transform_0(%arg0: i32, %arg1: i32, %arg2: i32) -> (i32, i32, i32, i32) {
    %c0_i32 = arith.constant 0 : i32
    %0 = arith.muli %arg0, %c0_i32 : i32
    %1 = arith.addi %0, %arg2 : i32
    %c0_i32_0 = arith.constant 0 : i32
    %c0_i32_1 = arith.constant 0 : i32
    %c0_i32_2 = arith.constant 0 : i32
    return %arg1, %c0_i32_0, %1, %c0_i32_1 : i32, i32, i32, i32
  }
  func.func @transform_1(%arg0: i32, %arg1: i32, %arg2: i32) -> (i32, i32, i32) {
    %c0_i32 = arith.constant 0 : i32
    %0 = arith.muli %arg0, %c0_i32 : i32
    %1 = arith.addi %0, %arg2 : i32
    %c0_i32_0 = arith.constant 0 : i32
    %c0_i32_1 = arith.constant 0 : i32
    return %arg1, %1, %c0_i32_0 : i32, i32, i32
  }
  func.func @transform_2(%arg0: i32, %arg1: i32, %arg2: i32) -> (i32, i32) {
    %c0_i32 = arith.constant 0 : i32
    %c0_i32_0 = arith.constant 0 : i32
    %c0_i32_1 = arith.constant 0 : i32
    return %c0_i32, %c0_i32_0 : i32, i32
  }
  func.func @transform_3(%arg0: i32, %arg1: i32, %arg2: i32) -> (i32, i32) {
    %c0_i32 = arith.constant 0 : i32
    %c0_i32_0 = arith.constant 0 : i32
    %c0_i32_1 = arith.constant 0 : i32
    return %c0_i32, %c0_i32_0 : i32, i32
  }
  func.func @transform_4(%arg0: i32, %arg1: i32, %arg2: i32) -> (i32, i32) {
    %c0_i32 = arith.constant 0 : i32
    %c0_i32_0 = arith.constant 0 : i32
    %c0_i32_1 = arith.constant 0 : i32
    return %c0_i32, %c0_i32_0 : i32, i32
  }
  func.func @transform_5(%arg0: i32, %arg1: i32, %arg2: i32) -> (i32, i32) {
    %c0_i32 = arith.constant 0 : i32
    %c0_i32_0 = arith.constant 0 : i32
    %c0_i32_1 = arith.constant 0 : i32
    return %c0_i32, %c0_i32_0 : i32, i32
  }
  func.func @transform_6(%arg0: i32, %arg1: i32, %arg2: i32) -> (i32, i32, i32) {
    %c0_i32 = arith.constant 0 : i32
    %c0_i32_0 = arith.constant 0 : i32
    %c0_i32_1 = arith.constant 0 : i32
    return %arg0, %c0_i32, %c0_i32_0 : i32, i32, i32
  }
}

</mosaic_0001>

<bundles_post_ra>
// kernel: squeeze.3
= control target key start
LH: loop header
LB: loop body
LE: loop exit
PB: predicated region body
PF: predicated region fallthrough
CT: control target
= control target key end

     0   :  { %2 = vsyncpa [#allocation1], 0  ;;  %s123_s8 = smov [#allocation0]   ;;  %s150_s0 = inlined_call_operand.hbm [shape: s32[2,1,16,16], index: 0, kind: input, shape index: {}]   ;;  %s151_s1 = inlined_call_operand.vmem [shape: s32[2,2,128], index: 1, kind: output, shape index: {}]  }
   0x1   :  { %s6_s0 = sshll.u32 %s150_s0, 4  ;;  %s8_s9 = sshll.u32 %s123_s8, 4  ;;  %s7_s0 = int_to_ptr.hbm [resolvable:$true] %s6_s0  ;;  %s9_s9 = int_to_ptr.vmem [resolvable:$true] %s8_s9 }
   0x2   :  { %11 = dma.hbm_to_vmem [thread:$0]  %s7_s0, 512, %s9_s9, [#allocation1]  }
   0x3   :  { %121 = dma.done.wait [#allocation1], 512  }
   0x4   :  { %122 = vsyncadd [#allocation1], 4294966784  ;;  %v20_v0 = vld [vmem:[#allocation0 + $0x7] ss:$8 sm:$0xf]   ;;  %s124_s10 = smov 112  }
   0x5   :  { %v36_v1 = vld [vmem:[#allocation0 + $0x5] ss:$8 sm:$0xf]   ;;  %21 = vrot.lane.b32.xlu0 %v20_v0, %s124_s10  ;;  %s125_s11 = smov 80   ;;  %s126_s12 = smov 48   ;;  %vm15_vm0 = vcmask 130048  }
   0x6   :  { %37 = vrot.lane.b32.xlu1 %v36_v1, %s125_s11  ;;  %v52_v2 = vld [vmem:[#allocation0 + $0x3] ss:$8 sm:$0xf]   ;;  %v28_v3 = vld [vmem:[#allocation0 + $0x6] ss:$8 sm:$0xf]  }
   0x7   :  { %53 = vrot.lane.b32.xlu2 %v52_v2, %s126_s12  ;;  %v44_v4 = vld [vmem:[#allocation0 + $0x4] ss:$8 sm:$0xf]   ;;  %v60_v5 = vld [vmem:[#allocation0 + $0x2] ss:$8 sm:$0xf]  }
   0x8   :  { %s127_s13 = smov 96   ;;  %s128_s14 = smov 64   ;;  %v68_v6 = vld [vmem:[#allocation0 + $0x1] ss:$8 sm:$0xf]   ;;  %vm23_vm1 = vcmask 1048448  }
   0x9   :  { %s129_s15 = smov 32   ;;  %s130_s16 = smov 16   ;;  %v14_v7 = vld [vmem:[#allocation0] ss:$8 sm:$0xf]   ;;  %vm31_vm2 = vcmask 917248  }
   0xa   :  { %16 = vst.msk [vmem:[#allocation2] sm:$0x3] %vm15_vm0, %v14_v7   ;;  %vm39_vm3 = vcmask 786048   ;;  %vm47_vm4 = vcmask 654848   ;;  %vm55_vm5 = vcmask 523648   ;;  %vm63_vm6 = vcmask 392448  }
   0xb   :  { %18 = vst.msk [vmem:[#allocation2 + $0x6] sm:$0xc] %vm15_vm0, %v14_v7   ;;  %vm71_vm7 = vcmask 261248  }
   0xd   :  { %29 = vrot.lane.b32.xlu0 %v28_v3, %s127_s13 }
   0xe   :  { %45 = vrot.lane.b32.xlu1 %v44_v4, %s128_s14 }
   0xf   :  { %61 = vrot.lane.b32.xlu2 %v60_v5, %s129_s15 }
  0x15   :  { %69 = vrot.lane.b32.xlu0 %v68_v6, %s130_s16 }
  0x61   :  { %v54_v8 = vpop.permute.xlu2 %53  }
  0x69   :  { %v62_v9 = vpop.permute.xlu2 %61  }
  0x77   :  { %v22_v10 = vpop.permute.xlu0 %21  }
  0x78   :  { %v38_v11 = vpop.permute.xlu1 %37   ;;  %24 = vst.msk [vmem:[#allocation2] sm:$0x3] %vm23_vm1, %v22_v10  }
  0x79   :  { %26 = vst.msk [vmem:[#allocation2 + $0x6] sm:$0xc] %vm23_vm1, %v22_v10  }
  0x7f   :  { %v30_v12 = vpop.permute.xlu0 %29  }
  0x80   :  { %v46_v13 = vpop.permute.xlu1 %45   ;;  %32 = vst.msk [vmem:[#allocation2] sm:$0x3] %vm31_vm2, %v30_v12  }
  0x81   :  { %34 = vst.msk [vmem:[#allocation2 + $0x6] sm:$0xc] %vm31_vm2, %v30_v12  }
  0x82   :  { %40 = vst.msk [vmem:[#allocation2] sm:$0x3] %vm39_vm3, %v38_v11  }
  0x83   :  { %42 = vst.msk [vmem:[#allocation2 + $0x6] sm:$0xc] %vm39_vm3, %v38_v11  }
  0x84   :  { %48 = vst.msk [vmem:[#allocation2] sm:$0x3] %vm47_vm4, %v46_v13  }
  0x85   :  { %50 = vst.msk [vmem:[#allocation2 + $0x6] sm:$0xc] %vm47_vm4, %v46_v13  }
  0x86   :  { %56 = vst.msk [vmem:[#allocation2] sm:$0x3] %vm55_vm5, %v54_v8  }
  0x87   :  { %58 = vst.msk [vmem:[#allocation2 + $0x6] sm:$0xc] %vm55_vm5, %v54_v8   ;;  %v70_v14 = vpop.permute.xlu0 %69  }
  0x88   :  { %64 = vst.msk [vmem:[#allocation2] sm:$0x3] %vm63_vm6, %v62_v9  }
  0x89   :  { %66 = vst.msk [vmem:[#allocation2 + $0x6] sm:$0xc] %vm63_vm6, %v62_v9  }
  0x8a   :  { %72 = vst.msk [vmem:[#allocation2] sm:$0x3] %vm71_vm7, %v70_v14  }
  0x8b   :  { %74 = vst.msk [vmem:[#allocation2 + $0x6] sm:$0xc] %vm71_vm7, %v70_v14  }
  0x91   :  { %v77_v15 = vld [vmem:[#allocation2] sm:$0x3] }
  0x92   :  { %80 = vst [vmem:[%s151_s1] sm:$0x3] %v77_v15  ;;  %v82_v16 = vld [vmem:[#allocation2 + $0x8] sm:$0x3] }
  0x93   :  { %88 = vst [vmem:[%s151_s1 + $0x2] sm:$0x3] %v82_v16 }
  0x94   :  { %87 = vsyncpa [#allocation1], 1 }

// kernel: elbo_loss.1
= control target key start
LH: loop header
LB: loop body
LE: loop exit
PB: predicated region body
PF: predicated region fallthrough
CT: control target
= control target key end

     0   :  { %s594_s21 = smov 0   ;;  %s596_s22 = smov 0   ;;  %s657_s0 = inlined_call_operand.vmem [shape: f32[2,2,2,128], index: 0, kind: input, shape index: {}]   ;;  %s658_s1 = inlined_call_operand.vmem [shape: s32[2,2,128], index: 1, kind: input, shape index: {}]   ;;  %s659_s2 = inlined_call_operand.vmem [shape: f32[2,256], index: 2, kind: input, shape index: {}]   ;;  %s660_s3 = inlined_call_operand.vmem [shape: f32[2,256], index: 3, kind: input, shape index: {}]   ;;  %s661_s4 = inlined_call_operand.vmem [shape: f32[2,256], index: 4, kind: input, shape index: {}]   ;;  %s662_s5 = inlined_call_operand.vmem [shape: f32[2,256], index: 5, kind: input, shape index: {}]   ;;  %s663_s6 = inlined_call_operand.vmem [shape: f32[1,1,128], index: 6, kind: output, shape index: {}]  }
   0x1   :  { %s598_s23 = smov 0  }
   0x2 LB: > { %s31_s24 = sadd.s32 1, %s552_s22  ;;  %p482_p0 = scmp.ge.s32.totalorder %s556_s23, 1  ;;  %s556_s23 = sphi %s598_s23, %s16_s23   ;;  %s552_s22 = sphi %s596_s22, %s665_s22   ;;  %s548_s21 = sphi %s594_s21, %s664_s21  }
   0x3   : > { %p33_p1 = scmp.ge.s32.totalorder %s31_s24, 2  ;;  %p250_p2 = scmp.lt.s32.totalorder %s556_s23, 3 }
   0x5   : > { %s667_s24 = smov (%p33_p1, %s31_s24), 0  ;;  %p251_p3 = pnand %p482_p0, %p250_p2 }
   0x6   : > { %p288_p4 = scmp.lt.s32.totalorder (!%p251_p3), %s548_s21, 1  ;;  %p306_p5 = scmp.eq.s32.totalorder (!%p251_p3), %s548_s21, 0 }
   0x7   : > { %254 = sbr.rel (%p251_p3) target bundleno = 251 (0xfb), region = 44 }
   0xc   : > { %s289_s25 = scalar_select %p288_p4, %s548_s21, 1  ;;  %v558_v0 = vmov (%p306_p5), 0.0  }
   0xd   : > { %311 = sbr.rel (!%p306_p5) target bundleno = 18 (0x12), region = 48  ;;  %312 = vst [vmem:[#allocation2] sm:$0x3] (%p306_p5), %v558_v0 }
   0xe   : > { %s492_s26 = sshll.u32 %s289_s25, 2  ;;  %s485_s27 = sshll.u32 %s289_s25, 1 }
   0xf   : > { %s295_s30 = scalar_lea.vmem %s657_s0, %s492_s26  ;;  %s302_s9 = scalar_lea.vmem %s658_s1, %s485_s27 }
  0x12 PF: > { %v313_v1 = vld [vmem:[%s295_s30] sm:$0x3]  ;;  %v314_v2 = vld [vmem:[%s295_s30 + $0x2] sm:$0x3]  ;;  %vm316_vm0 = vcmask 1041408   ;;  %p342_p6 = scmp.eq.s32.totalorder %s548_s21, 1 }
  0x13   : > { %v317_v3 = vsel %vm316_vm0, %v313_v1, -inf  ;;  %v318_v4 = vsel %vm316_vm0, %v314_v2, -inf  ;;  %v315_v14 = vld [vmem:[%s302_s9] sm:$0x3]  ;;  %v393_v63 = vlaneseq (%p342_p6) }
  0x14   : > { %v319_v5 = vmax.f32 %v317_v3, %v318_v4  ;;  %vm332_vm1 = vcmp.eq.s32.totalorder %v315_v14, 0  ;;  %vm335_vm2 = vcmp.eq.s32.totalorder %v315_v14, 1  ;;  %v339_v22 = vld [vmem:[#allocation2] sm:$0x3]  ;;  %v359_v26 = vld [vmem:[%s660_s3] sm:$0xf] (%p342_p6) }
  0x15   : > { %v333_v16 = vsel %vm332_vm1, %v313_v1, 0.0  ;;  %v336_v17 = vsel %vm335_vm2, %v314_v2, 0.0  ;;  %v361_v28 = vld [vmem:[%s662_s5] sm:$0xf] (%p342_p6)  ;;  %v394_v0 = vand.u32 (%p342_p6), 127, %v393_v63 }
  0x16   : > { %v320_v6 = vsub.f32 %v313_v1, %v319_v5  ;;  %v321_v7 = vsub.f32 %v314_v2, %v319_v5  ;;  %v337_v20 = vadd.f32 %v336_v17, %v333_v16  ;;  %v358_v29 = vld [vmem:[%s659_s2] sm:$0xf] (%p342_p6)  ;;  %v362_v31 = vsub.f32 (%p342_p6), %v361_v28, %v359_v26 }
  0x17   : > { %v360_v30 = vld [vmem:[%s661_s4] sm:$0xf] (%p342_p6)  ;;  %v369_v32 = vsub.f32 (%p342_p6), 0.0, %v361_v28  ;;  %vm396_vm3 = vcmp.eq.s32.totalorder (%p342_p6), %v394_v0, 1  ;;  %vm395_vm4 = vcmp.eq.s32.totalorder (%p342_p6), %v394_v0, 0 }
  0x18   : > { %v322_v8 = vmul.f32 1.442695, %v320_v6  ;;  %v324_v9 = vmul.f32 1.442695, %v321_v7  ;;  %v363_v33 = vsub.f32 (%p342_p6), 0.0, %v362_v31  ;;  %v367_v35 = vsub.f32 (%p342_p6), %v358_v29, %v360_v30 }
  0x19   : > { %v370_v34 = vmul.f32 (%p342_p6), 1.442695, %v369_v32 }
  0x1a   : > { %524 = vpow2.f32 %v322_v8  ;;  %v364_v36 = vmul.f32 (%p342_p6), 1.442695, %v363_v33  ;;  %v368_v37 = vmul.f32 (%p342_p6), %v367_v35, %v367_v35 }
  0x1b   : > { %526 = vpow2.f32 %v324_v9 }
  0x20   : > { %v525_v10 = vpop.eup %524 }
  0x21   : > { %v527_v11 = vpop.eup %526  ;;  %v326_v12 = vsel %vm316_vm0, %v525_v10, 0.0 }
  0x22   : > { %v327_v13 = vsel %vm316_vm0, %v527_v11, 0.0 }
  0x23   : > { %v328_v15 = vadd.f32 %v327_v13, %v326_v12 }
  0x25   : > { %528 = vlog2.f32 %v328_v15 }
  0x26   : > { %530 = vpow2.f32 (%p342_p6), %v370_v34 }
  0x27   : > { %532 = vpow2.f32 (%p342_p6), %v364_v36 }
  0x2b   : > { %v529_v18 = vpop.eup %528 }
  0x2c   : > { %v330_v19 = vmul.f32 0.6931472, %v529_v18  ;;  %v531_v38 = vpop.eup (%p342_p6), %530 }
  0x2d   : > { %v372_v39 = vmul.f32 (%p342_p6), %v531_v38, %v368_v37  ;;  %v533_v40 = vpop.eup (%p342_p6), %532 }
  0x2e   : > { %v331_v21 = vadd.f32 %v330_v19, %v319_v5  ;;  %v366_v41 = vadd.f32 (%p342_p6), %v533_v40, %v362_v31 }
  0x30   : > { %v338_v23 = vsub.f32 %v331_v21, %v337_v20  ;;  %346 = sbr.rel (!%p342_p6) target bundleno = 251 (0xfb), region = 52  ;;  %v373_v42 = vadd.f32 (%p342_p6), %v372_v39, %v366_v41 }
  0x32   : > { %v340_v24 = vadd.f32 %v339_v22, %v338_v23  ;;  %v488_v43 = vadd.f32 (%p342_p6), -1.0, %v373_v42 }
  0x34   : > { %341 = vst [vmem:[#allocation2] sm:$0x3] %v340_v24 }
  0x35   : > { %376 = vst [vmem:[#allocation1] ss:$4 sm:$0xff] %v488_v43 }
  0x3b   : > { %v347_v25 = vld [vmem:[#allocation2] sm:$0x3] }
  0x3c   : > { %v348_v27 = vsel %vm316_vm0, %v347_v25, 0.0  ;;  %v377_v44 = vld.sshfl [vmem:[#allocation1] sm:$0xff pattern:$0x73625140] }
  0x3d   : > { %349 = vadd.xlane.f32.xlu0 %v348_v27  ;;  %v378_v45 = vld.sshfl [vmem:[#allocation1 + $0x8] sm:$0xff pattern:$0x73625140]  ;;  %v381_v46 = vsel %vm316_vm0, %v377_v44, 0.0 }
  0x3e   : > { %v382_v47 = vsel %vm316_vm0, %v378_v45, 0.0 }
  0x3f   : > { %v383_v48 = vadd.f32 %v382_v47, %v381_v46 }
  0x45   : > { %384 = vadd.xlane.f32.xlu0 %v383_v48 }
  0xb0   : > { %v350_v49 = vpop.xlane.xlu0 %349 }
  0xb1   : > { %v351_v50 = vrot.slane %v350_v49, 4 }
  0xb3   : > { %v352_v51 = vadd.f32 %v351_v50, %v350_v49 }
  0xb5   : > { %v353_v52 = vrot.slane %v352_v51, 2 }
  0xb7   : > { %v354_v53 = vadd.f32 %v353_v52, %v352_v51 }
  0xb8   : > { %v385_v56 = vpop.xlane.xlu0 %384 }
  0xb9   : > { %v355_v54 = vrot.slane %v354_v53, 1  ;;  %v386_v57 = vrot.slane %v385_v56, 4 }
  0xbb   : > { %v356_v55 = vadd.f32 %v355_v54, %v354_v53  ;;  %v387_v58 = vadd.f32 %v386_v57, %v385_v56 }
  0xbd   : > { %495 = vpush %v356_v55  ;;  %v388_v59 = vrot.slane %v387_v58, 2 }
  0xbf   : > { %v389_v60 = vadd.f32 %v388_v59, %v387_v58 }
  0xc1   : > { %v390_v61 = vrot.slane %v389_v60, 1 }
  0xc3   : > { %v391_v62 = vadd.f32 %v390_v61, %v389_v60 }
  0xc5   : > { %497 = vpush %v391_v62 }
  0xee   : > { %s496_s18 = spop %495 }
  0xef   : > { %v399_v2 = vstv %s496_s18 }
  0xf6   : > { %s498_s19 = spop %497 }
  0xf7   : > { %v397_v1 = vstv %s498_s19 }
  0xf8   : > { %v398_v3 = vsel %vm396_vm3, %v397_v1, 0.0 }
  0xf9   : > { %v400_v4 = vsel %vm395_vm4, %v399_v2, %v398_v3 }
  0xfa   : > { %401 = vst [vmem:[%s663_s6] sm:$0x1] %v400_v4 }
  0xfb PF: > { %s16_s23 = sadd.s32 1, %s556_s23   ;;  %s664_s21 = smov %s552_s22 }
  0xfc   : > { %p13_p7 = scmp.ge.s32.totalorder %s16_s23, 4   ;;  %s665_s22 = smov %s667_s24 }
  0xfe   :  { %15 = sbr.rel (!%p13_p7) target bundleno = 2 (0x2), region = 85 }

</bundles_post_ra>
